<compile_context>
chip_gen: v6e
topology: v6e:2x2x1
jax: 0.10.0
libtpu: 0.0.40
codegen_flags: <defaults>
</compile_context>

<pallas_src>
import math

import jax
import jax.numpy as jnp
from jax.experimental import pallas as pl
from jax.experimental.pallas import tpu as pltpu


_TARGET_BLOCK_BYTES = 4 * 1024 * 1024    # ~4 MiB blocks (amortize ~0.35 us/step)
_VMEM_LIMIT_BYTES = 48 * 1024 * 1024     # 2x headroom over ~24 MiB working set


def _build_pe(size: int, max_len: int = 5000, dtype=jnp.float32) -> jnp.ndarray:
    """Deterministic sin/cos positional table, shape (max_len, size)."""
    if size % 2 != 0:
        raise ValueError(
            f"Cannot use sin/cos positional encoding with odd dim (got dim={size})"
        )
    position = jnp.arange(0, max_len, dtype=jnp.float32)[:, None]            # (max_len, 1)
    div_term = jnp.exp(jnp.arange(0, size, 2, dtype=jnp.float32)
                       * -(math.log(10000.0) / size))                        # (size/2,)
    pe = jnp.zeros((max_len, size), dtype=jnp.float32)
    pe = pe.at[:, 0::2].set(jnp.sin(position * div_term))
    pe = pe.at[:, 1::2].set(jnp.cos(position * div_term))
    return pe.astype(dtype)


def _sublane(itemsize: int) -> int:
    # Second-minor tiling requirement by element width (f32: 8, bf16: 16, int8: 32).
    return {4: 8, 2: 16, 1: 32}.get(itemsize, 8)


def _choose_tiles(B: int, S: int, D: int, itemsize: int,
                  target_bytes: int = _TARGET_BLOCK_BYTES) -> tuple[int, int]:
    """Pick (bt, ts): batch rows and sequence rows per block (~target_bytes)."""
    sub = _sublane(itemsize)
    row_bytes = max(1, D * itemsize)
    seq_bytes = S * row_bytes
    if S <= sub or seq_bytes <= target_bytes:
        # Short sequence: one tile covers it; fold batch rows into the block
        # so the block still approaches the byte target (B axis stays the
        # innermost grid axis for the pe re-DMA skip).
        bt = max(1, min(B, target_bytes // max(1, seq_bytes)))
        return bt, S
    # Long sequence: tile it, one batch row per block.
    rows = max(sub, ((target_bytes // row_bytes) // sub) * sub)
    ts = min(rows, (S // sub) * sub)
    # Prefer a tile that divides S exactly (no ragged edge block), but never
    # accept one below ts//2: a single ragged edge block is far cheaper than
    # hundreds of tiny per-step overheads.
    floor = max(sub, ts // 2)
    cand = ts
    while cand >= floor:
        if S % cand == 0:
            return 1, cand
        cand -= sub
    return 1, ts  # aligned tile; Pallas masks the ragged last block


def _pos_enc_kernel(emb_ref, pe_ref, out_ref):
    # emb_ref / out_ref: (bt, ts, D) tiles; pe_ref: (ts, D) tile.
    # Trailing-dim broadcast of pe over the bt rows (pure VPU add).
    out_ref[...] = (emb_ref[...] + pe_ref[...]).astype(out_ref.dtype)


def positional_encoding(emb: jnp.ndarray, pe_full: jnp.ndarray) -> jnp.ndarray:
    """emb: (B, S, D); pe_full: (max_len, D) with max_len >= S. Returns emb + pe[:S]."""
    B, S, D = emb.shape
    assert pe_full.shape[-1] == D and pe_full.shape[0] >= S

    # Production callers should cache a dtype-matched table at model init;
    # cast here only if strictly needed (no-op when dtypes already match).
    pe = pe_full if pe_full.dtype == emb.dtype else pe_full.astype(emb.dtype)

    itemsize = jnp.dtype(emb.dtype).itemsize
    bt, ts = _choose_tiles(B, S, D, itemsize)

    # (8, 128) block rule corner case: full-sequence tile whose length is not
    # sublane-aligned -> shrink pe so its block equals its full extent.
    if ts == S and (S % _sublane(itemsize)) != 0 and pe.shape[0] != S:
        pe = pe[:S]

    # Batch axis innermost: the pe block index (s, 0) is constant across the
    # inner batch loop, so Pallas skips re-fetching the pe window.
    grid = (pl.cdiv(S, ts), pl.cdiv(B, bt))

    return pl.pallas_call(
        _pos_enc_kernel,
        out_shape=jax.ShapeDtypeStruct((B, S, D), emb.dtype),
        grid_spec=pltpu.PrefetchScalarGridSpec(
            num_scalar_prefetch=0,
            grid=grid,
            in_specs=[
                # (bt, ts, D) tile of emb
                pl.BlockSpec((bt, ts, D), lambda s, b: (b, s, 0)),
                # matching (ts, D) window of the pe table (same for every b)
                pl.BlockSpec((ts, D), lambda s, b: (s, 0)),
            ],
            out_specs=pl.BlockSpec((bt, ts, D), lambda s, b: (b, s, 0)),
        ),
        input_output_aliases={0: 0},   # in-place into emb; pair with donation
        compiler_params=pltpu.CompilerParams(
            dimension_semantics=("parallel", "parallel"),
            vmem_limit_bytes=_VMEM_LIMIT_BYTES,
        ),
    )(emb, pe)


if __name__ == "__main__":
    B, S, D = 2, 16, 256       # batch, seq_len, hidden (D even, multiple of 128)
    MAX_LEN = 64               # small max_len for the synthetic table

    key = jax.random.PRNGKey(0)
    emb = jax.random.normal(key, (B, S, D), dtype=jnp.float32)

    # "Model init": build the table once, already in the call dtype.
    pe_full = _build_pe(D, MAX_LEN, dtype=emb.dtype)

    # Compute the reference BEFORE the kernel call (emb is donated / aliased).
    ref = jax.block_until_ready(emb + pe_full[None, :S, :])

    pos_enc = jax.jit(positional_encoding, donate_argnums=(0,))
    out = jax.block_until_ready(pos_enc(emb, pe_full))

    assert out.shape == (B, S, D)
    assert out.dtype == emb.dtype
    assert jnp.allclose(out, ref, atol=1e-6), "mismatch vs reference"

    print("KERNEL_OK")
</pallas_src>

<mosaic_0001>
module attributes {stable_mosaic.version = 11 : i64} {
  func.func @_pos_enc_kernel(%arg0: i32, %arg1: i32, %arg2: memref<2x16x256xf32, #tpu.memory_space<vmem>>, %arg3: memref<16x256xf32, #tpu.memory_space<vmem>>, %arg4: memref<2x16x256xf32, #tpu.memory_space<vmem>>) attributes {dimension_semantics = [#tpu.dimension_semantics<parallel>, #tpu.dimension_semantics<parallel>], iteration_bounds = array<i64: 1, 1>, scalar_prefetch = 0 : i64, scratch_operands = 0 : i64, tpu.core_type = #tpu.core_type<tc>, window_params = [{transform_indices = @transform_0, window_bounds = array<i64: 2, 16, 256>}, {transform_indices = @transform_1, window_bounds = array<i64: 16, 256>}, {transform_indices = @transform_2, window_bounds = array<i64: 2, 16, 256>}]} {
    %c0 = arith.constant 0 : index
    %c0_0 = arith.constant 0 : index
    %c0_1 = arith.constant 0 : index
    %0 = vector.load %arg2[%c0, %c0_0, %c0_1] : memref<2x16x256xf32, #tpu.memory_space<vmem>>, vector<2x16x256xf32>
    %c0_2 = arith.constant 0 : index
    %c0_3 = arith.constant 0 : index
    %1 = vector.load %arg3[%c0_2, %c0_3] : memref<16x256xf32, #tpu.memory_space<vmem>>, vector<16x256xf32>
    %2 = vector.shape_cast %1 : vector<16x256xf32> to vector<1x16x256xf32>
    %3 = vector.broadcast %2 : vector<1x16x256xf32> to vector<2x16x256xf32>
    %4 = arith.addf %0, %3 : vector<2x16x256xf32>
    %c0_4 = arith.constant 0 : index
    %c0_5 = arith.constant 0 : index
    %c0_6 = arith.constant 0 : index
    %5 = vector.load %arg4[%c0_4, %c0_5, %c0_6] : memref<2x16x256xf32, #tpu.memory_space<vmem>>, vector<2x16x256xf32>
    tpu.vector_store %arg4[%c0_4, %c0_5, %c0_6], %4 {strides = array<i32>} : memref<2x16x256xf32, #tpu.memory_space<vmem>>, vector<2x16x256xf32>,
    return
  }
  func.func @transform_0(%arg0: i32, %arg1: i32) -> (i32, i32, i32) {
    %c0_i32 = arith.constant 0 : i32
    %c0_i32_0 = arith.constant 0 : i32
    return %arg1, %arg0, %c0_i32 : i32, i32, i32
  }
  func.func @transform_1(%arg0: i32, %arg1: i32) -> (i32, i32) {
    %c0_i32 = arith.constant 0 : i32
    %c0_i32_0 = arith.constant 0 : i32
    return %arg0, %c0_i32 : i32, i32
  }
  func.func @transform_2(%arg0: i32, %arg1: i32) -> (i32, i32, i32) {
    %c0_i32 = arith.constant 0 : i32
    %c0_i32_0 = arith.constant 0 : i32
    return %arg1, %arg0, %c0_i32 : i32, i32, i32
  }
}

</mosaic_0001>

<bundles_post_ra>
// kernel: positional_encoding.1
= control target key start
LH: loop header
LB: loop body
LE: loop exit
PB: predicated region body
PF: predicated region fallthrough
CT: control target
= control target key end

     0   :  { %7 = vsyncpa [#allocation3], 0  ;;  %s195_s0 = inlined_call_operand.hbm [shape: f32[2,16,256], index: 0, kind: input, shape index: {}, may-alias: {0,2}]   ;;  %s196_s1 = inlined_call_operand.hbm [shape: f32[64,256], index: 1, kind: input, shape index: {}]   ;;  %s197_s2 = inlined_call_operand.hbm [shape: f32[2,16,256], index: 2, kind: output, shape index: {}, may-alias: {0,2}]  }
   0x1   :  { %8 = vsyncpa [#allocation6], 0 }
   0x2   :  { %9 = vsyncpa [#allocation4], 0  ;;  %s157_s9 = smov [#allocation2]  }
   0x3   :  { %s15_s10 = sshll.u32 %s157_s9, 4  ;;  %s16_s10 = int_to_ptr.vmem [resolvable:$true] %s15_s10 }
   0x4   :  { %s99_s11 = scalar_lea.vmem %s16_s10, 1024  ;;  %p104_p1 = scmp.lt.s32.totalorder %s16_s10, %s16_s10 }
   0x5   :  { %p100_p0 = scmp.ne.s32.totalorder %s16_s10, %s99_s11  ;;  %p105_p2 = scmp.lt.s32.totalorder %s99_s11, %s99_s11 }
   0x7   :  { %p106_p3 = por %p105_p2, %p104_p1 }
   0x9   :  { %p107_p4 = pnand %p106_p3, %p100_p0 }
   0xb   :  { %110 = shalt.err (!%p107_p4)
}
   0xc   :  { %s158_s12 = smov 256   ;;  %s159_s13 = smov 16  }
   0xd   :  { %21 = dma.hbm_to_vmem [thread:$0]  %s195_s0, 1024, %s16_s10, [#allocation3], %s158_s12, %s158_s12, %s159_s13  }
   0xe   :  { %s160_s16 = smov [#allocation5]  }
   0xf   :  { %s27_s17 = sshll.u32 %s160_s16, 4  ;;  %s28_s17 = int_to_ptr.vmem [resolvable:$true] %s27_s17 }
  0x10   :  { %s119_s18 = scalar_lea.vmem %s28_s17, 512  ;;  %p124_p6 = scmp.lt.s32.totalorder %s28_s17, %s28_s17 }
  0x11   :  { %p120_p5 = scmp.ne.s32.totalorder %s28_s17, %s119_s18  ;;  %p125_p7 = scmp.lt.s32.totalorder %s119_s18, %s119_s18 }
  0x13   :  { %p126_p8 = por %p125_p7, %p124_p6 }
  0x15   :  { %p127_p9 = pnand %p126_p8, %p120_p5 }
  0x17   :  { %130 = shalt.err (!%p127_p9)
}
  0x18   :  { %33 = dma.hbm_to_vmem [thread:$0]  %s196_s1, 512, %s28_s17, [#allocation6], %s158_s12, %s158_s12, %s159_s13  }
  0x19   :  { %151 = dma.done.wait [#allocation3], 1024  }
  0x1a   :  { %152 = vsyncadd [#allocation3], 4294966272 }
  0x1b   :  { %153 = dma.done.wait [#allocation6], 512  }
  0x1c   :  { %154 = vsyncadd [#allocation6], 4294966784  ;;  %v40_v0 = vld [vmem:[#allocation2] sm:$0xff]  ;;  %v41_v2 = vld [vmem:[#allocation2 + $0x8] sm:$0xff]  ;;  %s161_s0 = smov [#allocation7]  }
  0x1d   :  { %v48_v1 = vld [vmem:[#allocation5] sm:$0xff]  ;;  %v49_v4 = vld [vmem:[#allocation5 + $0x8] sm:$0xff]  ;;  %v42_v5 = vld [vmem:[#allocation2 + $0x10] sm:$0xff]  ;;  %s73_s21 = sshll.u32 %s161_s0, 4  ;;  %s74_s21 = int_to_ptr.vmem [resolvable:$true] %s73_s21 }
  0x1e   :  { %v52_v3 = vadd.f32 %v48_v1, %v40_v0  ;;  %v50_v6 = vld [vmem:[#allocation5 + $0x10] sm:$0xff]  ;;  %v53_v7 = vadd.f32 %v49_v4, %v41_v2  ;;  %v43_v9 = vld [vmem:[#allocation2 + $0x18] sm:$0xff]  ;;  %v44_v11 = vld [vmem:[#allocation2 + $0x20] sm:$0xff]  ;;  %s131_s1 = scalar_lea.vmem %s74_s21, 1024  ;;  %p136_p11 = scmp.lt.s32.totalorder %s74_s21, %s74_s21 }
  0x1f   :  { %v54_v8 = vadd.f32 %v50_v6, %v42_v5  ;;  %v51_v10 = vld [vmem:[#allocation5 + $0x18] sm:$0xff]  ;;  %v56_v13 = vadd.f32 %v48_v1, %v44_v11  ;;  %v45_v14 = vld [vmem:[#allocation2 + $0x28] sm:$0xff]  ;;  %v46_v15 = vld [vmem:[#allocation2 + $0x30] sm:$0xff]  ;;  %p132_p10 = scmp.ne.s32.totalorder %s74_s21, %s131_s1  ;;  %p137_p12 = scmp.lt.s32.totalorder %s131_s1, %s131_s1 }
  0x20   :  { %60 = vst [vmem:[#allocation7] sm:$0xff] %v52_v3  ;;  %v55_v12 = vadd.f32 %v51_v10, %v43_v9  ;;  %v47_v16 = vld [vmem:[#allocation2 + $0x38] sm:$0xff]  ;;  %61 = vst [vmem:[#allocation7 + $0x8] sm:$0xff] %v53_v7  ;;  %v57_v17 = vadd.f32 %v49_v4, %v45_v14  ;;  %v58_v18 = vadd.f32 %v50_v6, %v46_v15 }
  0x21   :  { %62 = vst [vmem:[#allocation7 + $0x10] sm:$0xff] %v54_v8  ;;  %v59_v19 = vadd.f32 %v51_v10, %v47_v16  ;;  %64 = vst [vmem:[#allocation7 + $0x20] sm:$0xff] %v56_v13  ;;  %p138_p13 = por %p137_p12, %p136_p11 }
  0x22   :  { %63 = vst [vmem:[#allocation7 + $0x18] sm:$0xff] %v55_v12  ;;  %65 = vst [vmem:[#allocation7 + $0x28] sm:$0xff] %v57_v17 }
  0x23   :  { %66 = vst [vmem:[#allocation7 + $0x30] sm:$0xff] %v58_v18  ;;  %67 = vst [vmem:[#allocation7 + $0x38] sm:$0xff] %v59_v19  ;;  %p139_p0 = pnand %p138_p13, %p132_p10 }
  0x25   :  { %142 = shalt.err (!%p139_p0)
}
  0x26   :  { %79 = dma.vmem_to_hbm [thread:$0]  %s74_s21, 1024, %s197_s2, [#allocation4], %s158_s12, %s158_s12, %s159_s13  }
  0x27   :  { %155 = dma.done.wait [#allocation4], 1024  }
  0x28   :  { %156 = vsyncadd [#allocation4], 4294966272 }
  0x29   :  { %83 = vsyncpa [#allocation3], 1 }
  0x2a   :  { %84 = vsyncpa [#allocation6], 1 }
  0x2b   :  { %85 = vsyncpa [#allocation4], 1 }

</bundles_post_ra>
